<compile_context>
chip_gen: v5e
topology: v5e:2x2
jax: 0.10.0
libtpu: 0.0.40
codegen_flags: <defaults>
</compile_context>

<pallas_src>
import jax
import jax.numpy as jnp
from jax.experimental import pallas as pl
from jax.experimental.pallas import tpu as pltpu


def _round_up(x, m):
    return ((x + m - 1) // m) * m


def _q_kernel(s_ref, a_ref, w1s_ref, w1a_ref, b1_ref, w2_ref, b2_ref,
              w3_ref, b3_ref, o_ref):
    # fc1 with the concat folded in: [s | a] @ W1 == s @ W1_s + a @ W1_a
    h1 = jnp.dot(s_ref[...], w1s_ref[...], preferred_element_type=jnp.float32)
    h1 = h1 + jnp.dot(a_ref[...], w1a_ref[...], preferred_element_type=jnp.float32)
    h1 = jnp.maximum(h1 + b1_ref[...], 0.0)                      # ReLU (VPU)

    # fc2
    h2 = jnp.dot(h1, w2_ref[...], preferred_element_type=jnp.float32) + b2_ref[...]
    h2 = jnp.maximum(h2, 0.0)                                    # ReLU (VPU)

    # fc3: contract H against the (1, H) weight row -> lane-dense (1, TB) out.
    out = jax.lax.dot_general(
        w3_ref[...], h2, (((1,), (1,)), ((), ())),
        preferred_element_type=jnp.float32)
    o_ref[...] = (out + b3_ref[0, 0]).astype(o_ref.dtype)


def q_forward(s, a, params, *, block_b=256):
    """s: (..., state_dim), a: (..., action_dim) -> (B, 1)"""
    w1, b1, w2, b2, w3, b3 = params
    S = s.shape[-1]
    A = a.shape[-1]
    H = w1.shape[1]

    s2 = s.reshape(-1, S).astype(jnp.float32)
    a2 = a.reshape(-1, A).astype(jnp.float32)
    B = s2.shape[0]

    # Split fc1's weight so the concatenated activation never materializes.
    w1s = w1[:S]                     # (S, H)
    w1a = w1[S:]                     # (A, H)
    w3r = w3.reshape(1, H)           # (1, H) row for the lane-dense fc3
    b3s = b3.reshape(1, 1)           # scalar, lives in SMEM

    # Batch tiling: TB is a multiple of 8; B padded up to a multiple of TB.
    TB = min(block_b, _round_up(B, 8))
    B_pad = _round_up(B, TB)
    if B_pad != B:
        pad = B_pad - B
        s2 = jnp.pad(s2, ((0, pad), (0, 0)))
        a2 = jnp.pad(a2, ((0, pad), (0, 0)))

    const = lambda shape: pl.BlockSpec(shape, lambda i: (0, 0))

    out_row = pl.pallas_call(
        _q_kernel,
        out_shape=jax.ShapeDtypeStruct((1, B_pad), jnp.float32),
        grid=(B_pad // TB,),
        in_specs=[
            pl.BlockSpec((TB, S), lambda i: (i, 0)),            # s tile
            pl.BlockSpec((TB, A), lambda i: (i, 0)),            # a tile
            const((S, H)),                                      # W1_s (resident)
            const((A, H)),                                      # W1_a (resident)
            const((1, H)),                                      # b1
            const((H, H)),                                      # W2
            const((1, H)),                                      # b2
            const((1, H)),                                      # w3 row
            pl.BlockSpec(memory_space=pltpu.MemorySpace.SMEM),  # b3 scalar
        ],
        out_specs=pl.BlockSpec((1, TB), lambda i: (0, i)),      # lane-dense out
        compiler_params=pltpu.CompilerParams(
            dimension_semantics=("parallel",)),
    )(s2, a2, w1s, w1a, b1, w2, b2, w3r, b3s)

    # (1, B_pad) -> (B, 1), matching torch's output layout.
    return out_row.reshape(B_pad, 1)[:B]


def init_q_params(key, state_dim, action_dim, hidden=256):
    """Deterministic synthetic init (uniform, PyTorch-Linear-style bounds)."""
    def linear(k, fan_in, fan_out):
        kw, kb = jax.random.split(k)
        bound = 1.0 / jnp.sqrt(fan_in)
        w = jax.random.uniform(kw, (fan_in, fan_out), jnp.float32, -bound, bound)
        b = jax.random.uniform(kb, (1, fan_out), jnp.float32, -bound, bound)
        return w, b

    k1, k2, k3 = jax.random.split(key, 3)
    w1, b1 = linear(k1, state_dim + action_dim, hidden)
    w2, b2 = linear(k2, hidden, hidden)
    w3, b3 = linear(k3, hidden, 1)
    return (w1, b1, w2, b2, w3, b3)


def q_reference(s, a, params):
    w1, b1, w2, b2, w3, b3 = params
    x = jnp.concatenate(
        [s.reshape(-1, s.shape[-1]), a.reshape(-1, a.shape[-1])], axis=-1
    ).astype(jnp.float32)
    h1 = jnp.maximum(x @ w1 + b1, 0.0)
    h2 = jnp.maximum(h1 @ w2 + b2, 0.0)
    return h2 @ w3 + b3


if __name__ == "__main__":
    state_dim, action_dim, batch = 16, 8, 4

    key = jax.random.PRNGKey(0)
    kp, ks, ka = jax.random.split(key, 3)

    params = init_q_params(kp, state_dim, action_dim, hidden=256)
    s = jax.random.normal(ks, (batch, state_dim), jnp.float32)
    a = jax.random.normal(ka, (batch, action_dim), jnp.float32)

    out = q_forward(s, a, params)
    jax.block_until_ready(out)

    ref = q_reference(s, a, params)
    assert out.shape == (batch, 1), out.shape
    assert jnp.allclose(out, ref, atol=1e-4, rtol=1e-4), "mismatch vs JAX reference"

    # Also exercise the multi-tile (grid > 1) path with a padded, larger batch.
    s_big = jax.random.normal(ks, (1000, state_dim), jnp.float32)
    a_big = jax.random.normal(ka, (1000, action_dim), jnp.float32)
    out_big = q_forward(s_big, a_big, params)
    jax.block_until_ready(out_big)
    ref_big = q_reference(s_big, a_big, params)
    assert out_big.shape == (1000, 1), out_big.shape
    assert jnp.allclose(out_big, ref_big, atol=1e-4, rtol=1e-4), "big-batch mismatch"

    print("KERNEL_OK")
</pallas_src>

<mosaic_0001>
module attributes {stable_mosaic.version = 11 : i64} {
  func.func @_q_kernel(%arg0: i32, %arg1: memref<8x16xf32, #tpu.memory_space<vmem>>, %arg2: memref<8x8xf32, #tpu.memory_space<vmem>>, %arg3: memref<16x256xf32, #tpu.memory_space<vmem>>, %arg4: memref<8x256xf32, #tpu.memory_space<vmem>>, %arg5: memref<1x256xf32, #tpu.memory_space<vmem>>, %arg6: memref<256x256xf32, #tpu.memory_space<vmem>>, %arg7: memref<1x256xf32, #tpu.memory_space<vmem>>, %arg8: memref<1x256xf32, #tpu.memory_space<vmem>>, %arg9: memref<1x1xf32, #tpu.memory_space<smem>>, %arg10: memref<1x8xf32, #tpu.memory_space<vmem>>) attributes {dimension_semantics = [#tpu.dimension_semantics<parallel>], iteration_bounds = array<i64: 1>, scalar_prefetch = 0 : i64, scratch_operands = 0 : i64, tpu.core_type = #tpu.core_type<tc>, window_params = [{transform_indices = @transform_0, window_bounds = array<i64: 8, 16>}, {transform_indices = @transform_1, window_bounds = array<i64: 8, 8>}, {pipeline_mode = #tpu.pipeline_mode<synchronous>, transform_indices = @transform_2, window_bounds = array<i64: 16, 256>}, {pipeline_mode = #tpu.pipeline_mode<synchronous>, transform_indices = @transform_3, window_bounds = array<i64: 8, 256>}, {pipeline_mode = #tpu.pipeline_mode<synchronous>, transform_indices = @transform_4, window_bounds = array<i64: 1, 256>}, {pipeline_mode = #tpu.pipeline_mode<synchronous>, transform_indices = @transform_5, window_bounds = array<i64: 256, 256>}, {pipeline_mode = #tpu.pipeline_mode<synchronous>, transform_indices = @transform_6, window_bounds = array<i64: 1, 256>}, {pipeline_mode = #tpu.pipeline_mode<synchronous>, transform_indices = @transform_7, window_bounds = array<i64: 1, 256>}, {transform_indices = @transform_8, window_bounds = array<i64: 1, 1>}, {transform_indices = @transform_9, window_bounds = array<i64: 1, 8>}]} {
    %c0 = arith.constant 0 : index
    %c0_0 = arith.constant 0 : index
    %0 = vector.load %arg1[%c0, %c0_0] : memref<8x16xf32, #tpu.memory_space<vmem>>, vector<8x16xf32>
    %c0_1 = arith.constant 0 : index
    %c0_2 = arith.constant 0 : index
    %1 = vector.load %arg3[%c0_1, %c0_2] : memref<16x256xf32, #tpu.memory_space<vmem>>, vector<16x256xf32>
    %cst = arith.constant dense<0.000000e+00> : vector<8x256xf32>
    %2 = tpu.matmul %0, %1, %cst {dimension_numbers = #tpu.dot_dimension_numbers<[1], [0], [0], [1], [0, 0, 1, 1], [], []>} : vector<8x16xf32>, vector<16x256xf32>, vector<8x256xf32> -> vector<8x256xf32>
    %c0_3 = arith.constant 0 : index
    %c0_4 = arith.constant 0 : index
    %3 = vector.load %arg2[%c0_3, %c0_4] : memref<8x8xf32, #tpu.memory_space<vmem>>, vector<8x8xf32>
    %c0_5 = arith.constant 0 : index
    %c0_6 = arith.constant 0 : index
    %4 = vector.load %arg4[%c0_5, %c0_6] : memref<8x256xf32, #tpu.memory_space<vmem>>, vector<8x256xf32>
    %cst_7 = arith.constant dense<0.000000e+00> : vector<8x256xf32>
    %5 = tpu.matmul %3, %4, %cst_7 {dimension_numbers = #tpu.dot_dimension_numbers<[1], [0], [0], [1], [0, 0, 1, 1], [], []>} : vector<8x8xf32>, vector<8x256xf32>, vector<8x256xf32> -> vector<8x256xf32>
    %6 = arith.addf %2, %5 : vector<8x256xf32>
    %c0_8 = arith.constant 0 : index
    %c0_9 = arith.constant 0 : index
    %7 = vector.load %arg5[%c0_8, %c0_9] : memref<1x256xf32, #tpu.memory_space<vmem>>, vector<1x256xf32>
    %8 = vector.broadcast %7 : vector<1x256xf32> to vector<8x256xf32>
    %9 = arith.addf %6, %8 : vector<8x256xf32>
    %cst_10 = arith.constant 0.000000e+00 : f32
    %10 = vector.broadcast %cst_10 : f32 to vector<8x256xf32>
    %11 = arith.maximumf %9, %10 : vector<8x256xf32>
    %c0_11 = arith.constant 0 : index
    %c0_12 = arith.constant 0 : index
    %12 = vector.load %arg6[%c0_11, %c0_12] : memref<256x256xf32, #tpu.memory_space<vmem>>, vector<256x256xf32>
    %cst_13 = arith.constant dense<0.000000e+00> : vector<8x256xf32>
    %13 = tpu.matmul %11, %12, %cst_13 {dimension_numbers = #tpu.dot_dimension_numbers<[1], [0], [0], [1], [0, 0, 1, 1], [], []>} : vector<8x256xf32>, vector<256x256xf32>, vector<8x256xf32> -> vector<8x256xf32>
    %c0_14 = arith.constant 0 : index
    %c0_15 = arith.constant 0 : index
    %14 = vector.load %arg7[%c0_14, %c0_15] : memref<1x256xf32, #tpu.memory_space<vmem>>, vector<1x256xf32>
    %15 = vector.broadcast %14 : vector<1x256xf32> to vector<8x256xf32>
    %16 = arith.addf %13, %15 : vector<8x256xf32>
    %cst_16 = arith.constant 0.000000e+00 : f32
    %17 = vector.broadcast %cst_16 : f32 to vector<8x256xf32>
    %18 = arith.maximumf %16, %17 : vector<8x256xf32>
    %c0_17 = arith.constant 0 : index
    %c0_18 = arith.constant 0 : index
    %19 = vector.load %arg8[%c0_17, %c0_18] : memref<1x256xf32, #tpu.memory_space<vmem>>, vector<1x256xf32>
    %cst_19 = arith.constant dense<0.000000e+00> : vector<1x8xf32>
    %20 = tpu.matmul %19, %18, %cst_19 {dimension_numbers = #tpu.dot_dimension_numbers<[1], [1], [0], [0], [0, 0, 1, 0], [], []>} : vector<1x256xf32>, vector<8x256xf32>, vector<1x8xf32> -> vector<1x8xf32>
    %c0_20 = arith.constant 0 : index
    %c0_21 = arith.constant 0 : index
    %21 = memref.load %arg9[%c0_20, %c0_21] : memref<1x1xf32, #tpu.memory_space<smem>>
    %22 = vector.broadcast %21 : f32 to vector<1x8xf32>
    %23 = arith.addf %20, %22 : vector<1x8xf32>
    %c0_22 = arith.constant 0 : index
    %c0_23 = arith.constant 0 : index
    %24 = vector.load %arg10[%c0_22, %c0_23] : memref<1x8xf32, #tpu.memory_space<vmem>>, vector<1x8xf32>
    tpu.vector_store %arg10[%c0_22, %c0_23], %23 {strides = array<i32>} : memref<1x8xf32, #tpu.memory_space<vmem>>, vector<1x8xf32>,
    return
  }
  func.func @transform_0(%arg0: i32) -> (i32, i32) {
    %c0_i32 = arith.constant 0 : i32
    %c0_i32_0 = arith.constant 0 : i32
    return %arg0, %c0_i32 : i32, i32
  }
  func.func @transform_1(%arg0: i32) -> (i32, i32) {
    %c0_i32 = arith.constant 0 : i32
    %c0_i32_0 = arith.constant 0 : i32
    return %arg0, %c0_i32 : i32, i32
  }
  func.func @transform_2(%arg0: i32) -> (i32, i32) {
    %c0_i32 = arith.constant 0 : i32
    %c0_i32_0 = arith.constant 0 : i32
    %c0_i32_1 = arith.constant 0 : i32
    return %c0_i32, %c0_i32_0 : i32, i32
  }
  func.func @transform_3(%arg0: i32) -> (i32, i32) {
    %c0_i32 = arith.constant 0 : i32
    %c0_i32_0 = arith.constant 0 : i32
    %c0_i32_1 = arith.constant 0 : i32
    return %c0_i32, %c0_i32_0 : i32, i32
  }
  func.func @transform_4(%arg0: i32) -> (i32, i32) {
    %c0_i32 = arith.constant 0 : i32
    %c0_i32_0 = arith.constant 0 : i32
    %c0_i32_1 = arith.constant 0 : i32
    return %c0_i32, %c0_i32_0 : i32, i32
  }
  func.func @transform_5(%arg0: i32) -> (i32, i32) {
    %c0_i32 = arith.constant 0 : i32
    %c0_i32_0 = arith.constant 0 : i32
    %c0_i32_1 = arith.constant 0 : i32
    return %c0_i32, %c0_i32_0 : i32, i32
  }
  func.func @transform_6(%arg0: i32) -> (i32, i32) {
    %c0_i32 = arith.constant 0 : i32
    %c0_i32_0 = arith.constant 0 : i32
    %c0_i32_1 = arith.constant 0 : i32
    return %c0_i32, %c0_i32_0 : i32, i32
  }
  func.func @transform_7(%arg0: i32) -> (i32, i32) {
    %c0_i32 = arith.constant 0 : i32
    %c0_i32_0 = arith.constant 0 : i32
    %c0_i32_1 = arith.constant 0 : i32
    return %c0_i32, %c0_i32_0 : i32, i32
  }
  func.func @transform_8(%arg0: i32) -> (i32, i32) {
    %c0_i32 = arith.constant 0 : i32
    %c0_i32_0 = arith.constant 0 : i32
    %c0_i32_1 = arith.constant 0 : i32
    return %c0_i32, %c0_i32_0 : i32, i32
  }
  func.func @transform_9(%arg0: i32) -> (i32, i32) {
    %c0_i32 = arith.constant 0 : i32
    %c0_i32_0 = arith.constant 0 : i32
    return %c0_i32, %arg0 : i32, i32
  }
}

</mosaic_0001>

<bundles_post_ra>
// kernel: tpu_custom_call.1
= control target key start
LH: loop header
LB: loop body
LE: loop exit
PB: predicated region body
PF: predicated region fallthrough
CT: control target
= control target key end

     0   :  { %15 = vsyncpa [#allocation4], 0  ;;  %s685_s0 = inlined_call_operand.hbm [shape: f32[8,16], index: 0, kind: input, shape index: {}]   ;;  %s686_s1 = inlined_call_operand.hbm [shape: f32[8,8], index: 1, kind: input, shape index: {}]   ;;  %s687_s2 = inlined_call_operand.hbm [shape: f32[16,256], index: 2, kind: input, shape index: {}]   ;;  %s688_s3 = inlined_call_operand.hbm [shape: f32[8,256], index: 3, kind: input, shape index: {}]   ;;  %s689_s4 = inlined_call_operand.vmem [shape: f32[1,256], index: 4, kind: input, shape index: {}]   ;;  %s690_s5 = inlined_call_operand.hbm [shape: f32[256,256], index: 5, kind: input, shape index: {}]   ;;  %s691_s6 = inlined_call_operand.vmem [shape: f32[1,256], index: 6, kind: input, shape index: {}]   ;;  %s692_s7 = inlined_call_operand.vmem [shape: f32[1,256], index: 7, kind: input, shape index: {}]   ;;  %s693_s8 = inlined_call_operand.<no memory space> [shape: f32[1,1], index: 8, kind: input, shape index: {}]   ;;  %s694_s9 = inlined_call_operand.hbm [shape: f32[1,8], index: 9, kind: output, shape index: {}]  }
   0x1   :  { %16 = vsyncpa [#allocation7], 0 }
   0x2   :  { %17 = vsyncpa [#allocation10], 0  ;;  %s35_s11 = sshll.u32 %s686_s1, 4  ;;  %s36_s11 = int_to_ptr.hbm [resolvable:$true] %s35_s11 }
   0x3   :  { %18 = vsyncpa [#allocation5], 0  ;;  %s597_s12 = smov [#allocation6]   ;;  %s59_s16 = sshll.u32 %s688_s3, 4  ;;  %s60_s16 = int_to_ptr.hbm [resolvable:$true] %s59_s16 }
   0x4   :  { %s37_s13 = sshll.u32 %s597_s12, 4  ;;  %s598_s17 = smov [#allocation9]   ;;  %s38_s13 = int_to_ptr.vmem [resolvable:$true] %s37_s13 }
   0x5   :  { %40 = dma.hbm_to_vmem [thread:$0]  %s36_s11, 128, %s38_s13, [#allocation7]  }
   0x6   :  { %s61_s18 = sshll.u32 %s598_s17, 4  ;;  %s24_s21 = sshll.u32 %s685_s0, 4  ;;  %s62_s18 = int_to_ptr.vmem [resolvable:$true] %s61_s18  ;;  %s25_s21 = int_to_ptr.hbm [resolvable:$true] %s24_s21 }
   0x7   :  { %64 = dma.hbm_to_vmem [thread:$0]  %s60_s16, 256, %s62_s18, [#allocation10]  }
   0x8   :  { %s45_s23 = sshll.u32 %s687_s2, 4  ;;  %s599_s24 = smov [#allocation3]   ;;  %s46_s23 = int_to_ptr.hbm [resolvable:$true] %s45_s23 }
   0x9   :  { %s26_s25 = sshll.u32 %s599_s24, 4  ;;  %s600_s3 = smov [#allocation8]   ;;  %s27_s25 = int_to_ptr.vmem [resolvable:$true] %s26_s25 }
   0xa   :  { %29 = dma.hbm_to_vmem [thread:$0]  %s25_s21, 128, %s27_s25, [#allocation4]  }
   0xb   :  { %s47_s26 = sshll.u32 %s600_s3, 4  ;;  %s601_s27 = smov 256   ;;  %s48_s26 = int_to_ptr.vmem [resolvable:$true] %s47_s26 }
   0xc   :  { %s602_s28 = smov 16   ;;  %s71_s30 = sshll.u32 %s690_s5, 4  ;;  %s72_s30 = int_to_ptr.hbm [resolvable:$true] %s71_s30 }
   0xd   :  { %53 = dma.hbm_to_vmem [thread:$0]  %s46_s23, 512, %s48_s26, [#allocation7], %s601_s27, %s601_s27, %s602_s28  }
   0xe   :  { %s603_s10 = smov [#allocation11]  }
   0xf   :  { %s73_s11 = sshll.u32 %s603_s10, 4  ;;  %s74_s11 = int_to_ptr.vmem [resolvable:$true] %s73_s11 }
  0x10   :  { %79 = dma.hbm_to_vmem [thread:$0]  %s72_s30, 8192, %s74_s11, [#allocation10], %s601_s27, %s601_s27, %s602_s28  }
  0x11   :  { %589 = dma.done.wait [#allocation4], 128  }
  0x12   :  { %590 = vsyncadd [#allocation4], 4294967168 }
  0x13   :  { %591 = dma.done.wait [#allocation7], 640  }
  0x14   :  { %592 = vsyncadd [#allocation7], 4294966656 }
  0x15   :  { %593 = dma.done.wait [#allocation10], 8448  }
  0x16   :  { %594 = vsyncadd [#allocation10], 4294958848  ;;  %v109_v0 = vld [vmem:[#allocation8 + $0x10] sm:$0xff]  ;;  %v107_v1 = vld [vmem:[#allocation8] sm:$0xff]  ;;  %vm158_vm0 = vcmask 130048   ;;  %vm114_vm1 = vcmask 64512  }
  0x17   :  { %v110_v2 = vld [vmem:[#allocation8 + $0x18] sm:$0xff]  ;;  %176 = vmatpush.msra.mxu2 %v109_v0  ;;  %v106_v3 = vld [vmem:[#allocation3] sm:$0xff]  ;;  %v108_v4 = vld [vmem:[#allocation8 + $0x8] sm:$0xff]  ;;  %s604_s16 = smov [#allocation12]   ;;  %s421_s19 = sshll.u32 %s694_s9, 4  ;;  %vm412_vm2 = vcmask 57344   ;;  %s422_s19 = int_to_ptr.hbm [resolvable:$true] %s421_s19 }
  0x18   :  { %196 = vmatpush.msra.mxu3 %v110_v2  ;;  %v112_v5 = vld [vmem:[#allocation9] sm:$0xff]  ;;  %v111_v6 = vld [vmem:[#allocation6] sm:$0xff]  ;;  %v113_v7 = vld [vmem:[#allocation9 + $0x8] sm:$0xff] }
  0x19   :  { %133 = vmatpush.msra.mxu0 %v112_v5  ;;  %177 = vmatpush.msra.mxu2 %v107_v1  ;;  %v242_v8 = vld [vmem:[#allocation11 + $0xf0] sm:$0xff]  ;;  %v243_v9 = vld [vmem:[#allocation11 + $0xf8] sm:$0xff]  ;;  %v240_v11 = vld [vmem:[#allocation11 + $0xe0] sm:$0xff] }
  0x1a   :  { %197 = vmatpush.msra.mxu3 %v108_v4  ;;  %435 = vmatmul.msk.f32.vlgmr.msra.gmra.mxu2 %vm158_vm0, %v106_v3  ;;  %v274_v10 = vld [vmem:[#allocation11 + $0x1f0] sm:$0xff]  ;;  %v275_v12 = vld [vmem:[#allocation11 + $0x1f8] sm:$0xff]  ;;  %v241_v13 = vld [vmem:[#allocation11 + $0xe8] sm:$0xff] }
  0x1b   :  { %436 = vmatmul.msk.f32.vlgmr.msra.gmra.mxu3 %vm158_vm0, %v106_v3  ;;  %433 = vmatmul.msk.f32.vlgmr.msra.gmra.mxu0 %vm114_vm1, %v111_v6  ;;  %v272_v14 = vld [vmem:[#allocation11 + $0x1e0] sm:$0xff]  ;;  %v238_v15 = vld [vmem:[#allocation11 + $0xd0] sm:$0xff]  ;;  %v273_v16 = vld [vmem:[#allocation11 + $0x1e8] sm:$0xff] }
  0x1c   :  { %153 = vmatpush.msra.mxu1 %v113_v7  ;;  %282 = vmatpush.msrb.mxu0 %v242_v8  ;;  %v239_v17 = vld [vmem:[#allocation11 + $0xd8] sm:$0xff]  ;;  %v270_v18 = vld [vmem:[#allocation11 + $0x1d0] sm:$0xff]  ;;  %v236_v19 = vld [vmem:[#allocation11 + $0xc0] sm:$0xff] }
  0x1d   :  { %434 = vmatmul.msk.f32.vlgmr.msra.gmra.mxu1 %vm114_vm1, %v111_v6  ;;  %322 = vmatpush.msrb.mxu2 %v243_v9  ;;  %v271_v20 = vld [vmem:[#allocation11 + $0x1d8] sm:$0xff]  ;;  %v237_v21 = vld [vmem:[#allocation11 + $0xc8] sm:$0xff]  ;;  %v268_v22 = vld [vmem:[#allocation11 + $0x1c0] sm:$0xff] }
  0x1e   :  { %302 = vmatpush.msrb.mxu1 %v274_v10  ;;  %283 = vmatpush.msrb.mxu0 %v240_v11  ;;  %v234_v23 = vld [vmem:[#allocation11 + $0xb0] sm:$0xff]  ;;  %v269_v24 = vld [vmem:[#allocation11 + $0x1c8] sm:$0xff]  ;;  %v235_v25 = vld [vmem:[#allocation11 + $0xb8] sm:$0xff] }
  0x1f   :  { %342 = vmatpush.msrb.mxu3 %v275_v12  ;;  %323 = vmatpush.msrb.mxu2 %v241_v13  ;;  %v266_v26 = vld [vmem:[#allocation11 + $0x1b0] sm:$0xff]  ;;  %v232_v27 = vld [vmem:[#allocation11 + $0xa0] sm:$0xff]  ;;  %v267_v28 = vld [vmem:[#allocation11 + $0x1b8] sm:$0xff] }
  0x20   :  { %303 = vmatpush.msrb.mxu1 %v272_v14  ;;  %284 = vmatpush.msrb.mxu0 %v238_v15  ;;  %v233_v29 = vld [vmem:[#allocation11 + $0xa8] sm:$0xff]  ;;  %v264_v30 = vld [vmem:[#allocation11 + $0x1a0] sm:$0xff]  ;;  %v230_v31 = vld [vmem:[#allocation11 + $0x90] sm:$0xff] }
  0x21   :  { %343 = vmatpush.msrb.mxu3 %v273_v16  ;;  %324 = vmatpush.msrb.mxu2 %v239_v17  ;;  %v265_v32 = vld [vmem:[#allocation11 + $0x1a8] sm:$0xff]  ;;  %v231_v33 = vld [vmem:[#allocation11 + $0x98] sm:$0xff]  ;;  %v262_v34 = vld [vmem:[#allocation11 + $0x190] sm:$0xff] }
  0x22   :  { %304 = vmatpush.msrb.mxu1 %v270_v18  ;;  %285 = vmatpush.msrb.mxu0 %v236_v19  ;;  %v228_v35 = vld [vmem:[#allocation11 + $0x80] sm:$0xff]  ;;  %v263_v36 = vld [vmem:[#allocation11 + $0x198] sm:$0xff]  ;;  %v229_v37 = vld [vmem:[#allocation11 + $0x88] sm:$0xff] }
  0x23   :  { %344 = vmatpush.msrb.mxu3 %v271_v20  ;;  %325 = vmatpush.msrb.mxu2 %v237_v21  ;;  %v260_v38 = vld [vmem:[#allocation11 + $0x180] sm:$0xff]  ;;  %v226_v39 = vld [vmem:[#allocation11 + $0x70] sm:$0xff]  ;;  %v261_v40 = vld [vmem:[#allocation11 + $0x188] sm:$0xff] }
  0x24   :  { %305 = vmatpush.msrb.mxu1 %v268_v22  ;;  %286 = vmatpush.msrb.mxu0 %v234_v23  ;;  %v227_v41 = vld [vmem:[#allocation11 + $0x78] sm:$0xff]  ;;  %v258_v42 = vld [vmem:[#allocation11 + $0x170] sm:$0xff]  ;;  %v224_v43 = vld [vmem:[#allocation11 + $0x60] sm:$0xff] }
  0x25   :  { %345 = vmatpush.msrb.mxu3 %v269_v24  ;;  %326 = vmatpush.msrb.mxu2 %v235_v25  ;;  %v259_v44 = vld [vmem:[#allocation11 + $0x178] sm:$0xff]  ;;  %v225_v45 = vld [vmem:[#allocation11 + $0x68] sm:$0xff]  ;;  %v256_v46 = vld [vmem:[#allocation11 + $0x160] sm:$0xff] }
  0x26   :  { %306 = vmatpush.msrb.mxu1 %v266_v26  ;;  %287 = vmatpush.msrb.mxu0 %v232_v27  ;;  %v222_v47 = vld [vmem:[#allocation11 + $0x50] sm:$0xff]  ;;  %v257_v48 = vld [vmem:[#allocation11 + $0x168] sm:$0xff]  ;;  %v223_v49 = vld [vmem:[#allocation11 + $0x58] sm:$0xff] }
  0x27   :  { %346 = vmatpush.msrb.mxu3 %v267_v28  ;;  %327 = vmatpush.msrb.mxu2 %v233_v29  ;;  %v254_v50 = vld [vmem:[#allocation11 + $0x150] sm:$0xff]  ;;  %v220_v51 = vld [vmem:[#allocation11 + $0x40] sm:$0xff]  ;;  %v255_v52 = vld [vmem:[#allocation11 + $0x158] sm:$0xff] }
  0x28   :  { %307 = vmatpush.msrb.mxu1 %v264_v30  ;;  %288 = vmatpush.msrb.mxu0 %v230_v31  ;;  %v221_v53 = vld [vmem:[#allocation11 + $0x48] sm:$0xff]  ;;  %v218_v54 = vld [vmem:[#allocation11 + $0x30] sm:$0xff]  ;;  %v252_v55 = vld [vmem:[#allocation11 + $0x140] sm:$0xff] }
  0x29   :  { %347 = vmatpush.msrb.mxu3 %v265_v32  ;;  %328 = vmatpush.msrb.mxu2 %v231_v33  ;;  %v219_v56 = vld [vmem:[#allocation11 + $0x38] sm:$0xff]  ;;  %v253_v57 = vld [vmem:[#allocation11 + $0x148] sm:$0xff]  ;;  %v216_v58 = vld [vmem:[#allocation11 + $0x20] sm:$0xff] }
  0x2a   :  { %308 = vmatpush.msrb.mxu1 %v262_v34  ;;  %289 = vmatpush.msrb.mxu0 %v228_v35  ;;  %v250_v59 = vld [vmem:[#allocation11 + $0x130] sm:$0xff]  ;;  %v217_v60 = vld [vmem:[#allocation11 + $0x28] sm:$0xff]  ;;  %v251_v61 = vld [vmem:[#allocation11 + $0x138] sm:$0xff] }
  0x2b   :  { %348 = vmatpush.msrb.mxu3 %v263_v36  ;;  %329 = vmatpush.msrb.mxu2 %v229_v37  ;;  %v214_v62 = vld [vmem:[#allocation11 + $0x10] sm:$0xff]  ;;  %v248_v63 = vld [vmem:[#allocation11 + $0x120] sm:$0xff]  ;;  %v215_v0 = vld [vmem:[#allocation11 + $0x18] sm:$0xff]  ;;  %v366_v37 = vstv %s693_s8 }
  0x2c   :  { %309 = vmatpush.msrb.mxu1 %v260_v38  ;;  %290 = vmatpush.msrb.mxu0 %v226_v39  ;;  %v249_v1 = vld [vmem:[#allocation11 + $0x128] sm:$0xff]  ;;  %v212_v2 = vld [vmem:[#allocation11] sm:$0xff]  ;;  %v246_v3 = vld [vmem:[#allocation11 + $0x110] sm:$0xff] }
  0x2d   :  { %349 = vmatpush.msrb.mxu3 %v261_v40  ;;  %330 = vmatpush.msrb.mxu2 %v227_v41  ;;  %v213_v4 = vld [vmem:[#allocation11 + $0x8] sm:$0xff]  ;;  %v247_v5 = vld [vmem:[#allocation11 + $0x118] sm:$0xff]  ;;  %v244_v6 = vld [vmem:[#allocation11 + $0x100] sm:$0xff] }
  0x2e   :  { %310 = vmatpush.msrb.mxu1 %v258_v42  ;;  %291 = vmatpush.msrb.mxu0 %v224_v43  ;;  %v245_v7 = vld [vmem:[#allocation11 + $0x108] sm:$0xff]  ;;  %v202_v8 = vld [vmem:[%s689_s4] sm:$0x3] }
  0x2f   :  { %350 = vmatpush.msrb.mxu3 %v259_v44  ;;  %331 = vmatpush.msrb.mxu2 %v225_v45  ;;  %v204_v11 = vperm.slane %v202_v8, 0  ;;  %v205_v12 = vperm.slane %v202_v8, 1  ;;  %v276_v21 = vld [vmem:[%s691_s6] sm:$0x3] }
  0x30   :  { %311 = vmatpush.msrb.mxu1 %v256_v46  ;;  %292 = vmatpush.msrb.mxu0 %v222_v47  ;;  %v278_v22 = vperm.slane %v276_v21, 0  ;;  %v279_v27 = vperm.slane %v276_v21, 1  ;;  %v364_v28 = vld [vmem:[%s692_s7] sm:$0x3]  ;;  %s419_s7 = sshll.u32 %s604_s16, 4  ;;  %s420_s7 = int_to_ptr.vmem [resolvable:$true] %s419_s7 }
  0x31   :  { %351 = vmatpush.msrb.mxu3 %v257_v48  ;;  %332 = vmatpush.msrb.mxu2 %v223_v49  ;;  %v368_v31 = vperm.slane %v364_v28, 0  ;;  %v369_v36 = vperm.slane %v364_v28, 1 }
  0x32   :  { %312 = vmatpush.msrb.mxu1 %v254_v50  ;;  %293 = vmatpush.msrb.mxu0 %v220_v51 }
  0x33   :  { %352 = vmatpush.msrb.mxu3 %v255_v52  ;;  %333 = vmatpush.msrb.mxu2 %v221_v53 }
  0x34   :  { %294 = vmatpush.msrb.mxu0 %v218_v54  ;;  %313 = vmatpush.msrb.mxu1 %v252_v55 }
  0x35   :  { %334 = vmatpush.msrb.mxu2 %v219_v56  ;;  %353 = vmatpush.msrb.mxu3 %v253_v57 }
  0x36   :  { %295 = vmatpush.msrb.mxu0 %v216_v58  ;;  %314 = vmatpush.msrb.mxu1 %v250_v59 }
  0x37   :  { %335 = vmatpush.msrb.mxu2 %v217_v60  ;;  %354 = vmatpush.msrb.mxu3 %v251_v61 }
  0x38   :  { %296 = vmatpush.msrb.mxu0 %v214_v62  ;;  %315 = vmatpush.msrb.mxu1 %v248_v63 }
  0x39   :  { %336 = vmatpush.msrb.mxu2 %v215_v0  ;;  %355 = vmatpush.msrb.mxu3 %v249_v1 }
  0x3a   :  { %297 = vmatpush.msrb.mxu0 %v212_v2  ;;  %316 = vmatpush.msrb.mxu1 %v246_v3 }
  0x3b   :  { %337 = vmatpush.msrb.mxu2 %v213_v4  ;;  %356 = vmatpush.msrb.mxu3 %v247_v5 }
  0x3c   :  { %317 = vmatpush.msrb.mxu1 %v244_v6 }
  0x3d   :  { %357 = vmatpush.msrb.mxu3 %v245_v7 }
  0x98   :  { %v135_v9 = vpop.f32.mrf.mxu0 }
  0x9a   :  { %v155_v10 = vpop.f32.mrf.mxu1 }
  0x9d   :  { %v179_v13 = vpop.f32.mrf.mxu2 }
  0x9e   :  { %v199_v14 = vpop.f32.mrf.mxu3  ;;  %v180_v15 = vadd.f32 %v179_v13, %v135_v9 }
  0x9f   :  { %v200_v16 = vadd.f32 %v199_v14, %v155_v10 }
  0xa0   :  { %v208_v17 = vadd.f32 %v204_v11, %v180_v15 }
  0xa1   :  { %v209_v18 = vadd.f32 %v205_v12, %v200_v16 }
  0xa2   :  { %v210_v19 = vmax.f32 %v208_v17, 0.0 }
  0xa3   :  { %v211_v20 = vmax.f32 %v209_v18, 0.0 }
  0xa4   :  { %298 = vmatmul.f32.vlgmr.msrb.gmra.mxu0 %v210_v19  ;;  %338 = vmatmul.f32.vlgmr.msrb.gmra.mxu2 %v210_v19 }
  0xa5   :  { %318 = vmatmul.f32.vlgmr.msrb.gmra.mxu1 %v211_v20  ;;  %358 = vmatmul.f32.vlgmr.msrb.gmra.mxu3 %v211_v20 }
 0x121   :  { %v299_v23 = vpop.f32.mrf.mxu0 }
 0x122   :  { %v300_v24 = vadd.f32 %v299_v23, %v278_v22  ;;  %v319_v25 = vpop.f32.mrf.mxu1 }
 0x124   :  { %v320_v26 = vadd.f32 %v319_v25, %v300_v24 }
 0x126   :  { %v362_v29 = vmax.f32 %v320_v26, 0.0 }
 0x127   :  { %v339_v30 = vpop.f32.mrf.mxu2 }
 0x128   :  { %v340_v32 = vadd.f32 %v339_v30, %v279_v27  ;;  %387 = vmatpush.xpose.msra.mxu0 %v362_v29  ;;  %v359_v33 = vpop.f32.mrf.mxu3 }
 0x12a   :  { %v360_v34 = vadd.f32 %v359_v33, %v340_v32 }
 0x12b   :  { %388 = vmatmul.f32.vlgmr.msra.gmra.mxu0 %v368_v31 }
 0x12c   :  { %v363_v35 = vmax.f32 %v360_v34, 0.0 }
 0x12e   :  { %407 = vmatpush.xpose.msra.mxu1 %v363_v35 }
 0x131   :  { %408 = vmatmul.f32.vlgmr.msra.gmra.mxu1 %v369_v36 }
 0x1a8   :  { %v389_v38 = vpop.f32.mrf.mxu0 }
 0x1a9   :  { %v390_v39 = vadd.f32 %v389_v38, %v366_v37 }
 0x1ae   :  { %v409_v40 = vpop.f32.mrf.mxu1 }
 0x1af   :  { %v410_v41 = vadd.f32 %v409_v40, %v390_v39 }
 0x1b1   :  { %413 = vst.msk [vmem:[#allocation12] sm:$0x1] %vm412_vm2, %v410_v41 }
 0x1b2   :  { %424 = dma.vmem_to_hbm [thread:$0]  %s420_s7, 16, %s422_s19, [#allocation5]  }
 0x1b3   :  { %595 = dma.done.wait [#allocation5], 16  }
 0x1b4   :  { %596 = vsyncadd [#allocation5], 4294967280 }
 0x1b5   :  { %429 = vsyncpa [#allocation4], 1 }
 0x1b6   :  { %430 = vsyncpa [#allocation7], 1 }
 0x1b7   :  { %431 = vsyncpa [#allocation10], 1 }
 0x1b8   :  { %432 = vsyncpa [#allocation5], 1 }

</bundles_post_ra>
